<compile_context>
chip_gen: v5e
topology: v5e:2x2
jax: 0.10.0
libtpu: 0.0.40
codegen_flags: <defaults>
</compile_context>

<pallas_src>
import functools

import jax
import jax.numpy as jnp
import numpy as np
from jax.experimental import pallas as pl
from jax.experimental.pallas import tpu as pltpu

HIDDEN = 50            # nn.Linear(1, 50) ...
FUSED = 2 * HIDDEN     # both MLPs fused into one 100-wide network
FPAD = 104             # 100 padded to the next multiple of 8 (f32 sublanes)


def _round_up(n, m):
    return ((n + m - 1) // m) * m


def _fused_pinn_kernel(x_ref, wb_ref, w2_ref, w3_ref, w4_ref, o_ref):
    """One (1, TM) column tile of time points -> (2, TM) outputs of both MLPs.

    x_ref : (1, TM)       time points, rows on the 128-lane axis
    wb_ref: (FPAD, 8)     packed small params: cols [w1, b1, b2, b3, b4(rows 0/1), 0, 0, 0]
    w2/w3 : (FPAD, FPAD)  block-diagonal fused hidden weights (zero-padded)
    w4_ref: (8, FPAD)     row 0 = fc1 head weights, row 1 = fc2 head weights, rest zero
    o_ref : (2, TM)       row 0 = fc1 output, row 1 = fc2 output
    """
    x = x_ref[...]                        # (1, TM)
    wb = wb_ref[...]                      # (FPAD, 8)
    w1, b1 = wb[:, 0:1], wb[:, 1:2]
    b2, b3 = wb[:, 2:3], wb[:, 3:4]
    b4 = wb[0:2, 4:5]                     # (2, 1): [b4_fc1; b4_fc2]

    # Layer 1 (K=1): VPU broadcast multiply instead of a degenerate MXU matmul.
    h = jnp.tanh(w1 * x + b1)                                              # (FPAD, TM)
    # Layers 2-3: fused block-diagonal matmuls on the MXU (TM lanes wide).
    h = jnp.tanh(jnp.dot(w2_ref[...], h, preferred_element_type=jnp.float32) + b2)
    h = jnp.tanh(jnp.dot(w3_ref[...], h, preferred_element_type=jnp.float32) + b3)
    # Layer 4: both 1-wide heads in one small MXU matmul (frees VPU/XLU slots).
    y = jnp.dot(w4_ref[...], h, preferred_element_type=jnp.float32)        # (8, TM)
    o_ref[...] = y[0:2, :] + b4


def pack_params(params):
    """Fuse fc1/fc2 parameters into the padded feature-major form (host side, once)."""
    (w11, b11, w12, b12, w13, b13, w14, b14,
     w21, b21, w22, b22, w23, b23, w24, b24) = params
    H, F, P = HIDDEN, FUSED, FPAD
    f32 = jnp.float32

    # Layer 1: per-feature weight / bias columns (FPAD, 1), padded rows are zero
    # so padded features stay exactly 0 through every tanh layer.
    w1 = jnp.zeros((P, 1), f32).at[:H].set(w11.T).at[H:F].set(w21.T)
    b1 = jnp.zeros((P, 1), f32).at[:H].set(b11.T).at[H:F].set(b21.T)
    b2 = jnp.zeros((P, 1), f32).at[:H].set(b12.T).at[H:F].set(b22.T)
    b3 = jnp.zeros((P, 1), f32).at[:H].set(b13.T).at[H:F].set(b23.T)
    # Layers 2/3: block-diagonal (FPAD, FPAD), acting as W @ h (feature-major).
    W2 = jnp.zeros((P, P), f32).at[:H, :H].set(w12.T).at[H:F, H:F].set(w22.T)
    W3 = jnp.zeros((P, P), f32).at[:H, :H].set(w13.T).at[H:F, H:F].set(w23.T)
    # Layer 4: one (8, FPAD) matrix -> single MXU matmul for both heads.
    W4 = jnp.zeros((8, P), f32).at[0, :H].set(w14[:, 0]).at[1, H:F].set(w24[:, 0])
    b4 = jnp.zeros((P, 1), f32).at[0, 0].set(b14[0, 0]).at[1, 0].set(b24[0, 0])

    wb_small = jnp.concatenate([w1, b1, b2, b3, b4, jnp.zeros((P, 3), f32)], axis=1)
    return wb_small, W2, W3, W4


def _choose_tile(n, max_tile_m):
    """Row tile: big enough to amortize per-step overhead, but >= 2 grid steps
    for mid-size N so the 'parallel' axis can use both v7x TensorCores."""
    lanes = 128
    n_lanes = _round_up(n, lanes)
    if n_lanes <= lanes:
        return lanes                                   # single tiny tile
    half = _round_up((n_lanes + 1) // 2, lanes)        # ~2 steps for mid-size N
    return min(max_tile_m, half)


@functools.partial(jax.jit, static_argnames=("max_tile_m",))
def pinn_forward(x, packed, max_tile_m=8192):
    """x: (1, N, 1) float32 -> (1, N, 2) float32 (== torch.cat((fc1(x), fc2(x)), -1))."""
    wb_small, W2, W3, W4 = packed
    B, N, _ = x.shape
    assert B == 1, "PINNModel is used with a leading batch of 1"

    # Feature-major layout: rows (time points) on the lane axis.
    x_t = x.reshape(B * N, 1).T.astype(jnp.float32)            # (1, N)

    tm = _choose_tile(N, max_tile_m)
    n_pad = _round_up(N, tm)
    x_t = jnp.pad(x_t, ((0, 0), (0, n_pad - N)))               # (1, n_pad)

    out = pl.pallas_call(
        _fused_pinn_kernel,
        out_shape=jax.ShapeDtypeStruct((2, n_pad), jnp.float32),
        grid_spec=pltpu.PrefetchScalarGridSpec(
            num_scalar_prefetch=0,
            grid=(n_pad // tm,),
            in_specs=[
                pl.BlockSpec((1, tm), lambda i: (0, i)),            # time points
                pl.BlockSpec((FPAD, 8), lambda i: (0, 0)),          # packed small params
                pl.BlockSpec((FPAD, FPAD), lambda i: (0, 0)),       # fused layer-2 weights
                pl.BlockSpec((FPAD, FPAD), lambda i: (0, 0)),       # fused layer-3 weights
                pl.BlockSpec((8, FPAD), lambda i: (0, 0)),          # fused layer-4 weights
            ],
            out_specs=pl.BlockSpec((2, tm), lambda i: (0, i)),      # lane-dense output
        ),
        compiler_params=pltpu.CompilerParams(
            dimension_semantics=("parallel",),
            # ~12 MB peak at TM=8192 (x + out + weights + ~3 live (FPAD,TM) f32
            # activations); set an explicit limit with headroom, safe on v7x (64 MiB).
            vmem_limit_bytes=48 * 1024 * 1024,
        ),
    )(x_t, wb_small, W2, W3, W4)

    # Back to the PyTorch convention: (1, N, 2), column 0 = fc1, column 1 = fc2.
    return out[:, :N].T.reshape(B, N, 2)


def _init_linear(key, fan_in, fan_out):
    # Deterministic init mimicking torch.nn.Linear default: U(-1/sqrt(fan_in), ...)
    kw, kb = jax.random.split(key)
    bound = 1.0 / np.sqrt(fan_in)
    w = jax.random.uniform(kw, (fan_in, fan_out), jnp.float32, -bound, bound)
    b = jax.random.uniform(kb, (1, fan_out), jnp.float32, -bound, bound)
    return w, b


def init_params(key):
    keys = jax.random.split(key, 8)
    # fc1
    w11, b11 = _init_linear(keys[0], 1, HIDDEN)
    w12, b12 = _init_linear(keys[1], HIDDEN, HIDDEN)
    w13, b13 = _init_linear(keys[2], HIDDEN, HIDDEN)
    w14, b14 = _init_linear(keys[3], HIDDEN, 1)
    # fc2
    w21, b21 = _init_linear(keys[4], 1, HIDDEN)
    w22, b22 = _init_linear(keys[5], HIDDEN, HIDDEN)
    w23, b23 = _init_linear(keys[6], HIDDEN, HIDDEN)
    w24, b24 = _init_linear(keys[7], HIDDEN, 1)
    return (w11, b11, w12, b12, w13, b13, w14, b14,
            w21, b21, w22, b22, w23, b23, w24, b24)


def _ref_forward(x, params):
    """Pure-JAX reference on the unfused parameters (matches torch semantics)."""
    (w11, b11, w12, b12, w13, b13, w14, b14,
     w21, b21, w22, b22, w23, b23, w24, b24) = params

    def mlp(h, w1, b1, w2, b2, w3, b3, w4, b4):
        h = jnp.tanh(h @ w1 + b1)
        h = jnp.tanh(h @ w2 + b2)
        h = jnp.tanh(h @ w3 + b3)
        return h @ w4 + b4

    y1 = mlp(x, w11, b11, w12, b12, w13, b13, w14, b14)
    y2 = mlp(x, w21, b21, w22, b22, w23, b23, w24, b24)
    return jnp.concatenate([y1, y2], axis=-1)


if __name__ == "__main__":
    key = jax.random.PRNGKey(0)
    kp, _ = jax.random.split(key)

    params = init_params(kp)
    packed = pack_params(params)   # one-time host-side fusion of fc1/fc2

    # Small shape consistent with the module: x is (1, T_N, 1) time points.
    # T_N deliberately NOT a multiple of the tile (padding path exercised) and
    # large enough to produce a 2-step grid (megacore path exercised).
    T_N = 300
    t = jnp.linspace(0.0, 10.0, T_N, dtype=jnp.float32)
    x = t.reshape(1, T_N, 1)

    y = pinn_forward(x, packed)
    y = jax.block_until_ready(y)

    y_ref = _ref_forward(x, params)
    assert y.shape == (1, T_N, 2)
    assert np.all(np.isfinite(np.asarray(y)))
    np.testing.assert_allclose(np.asarray(y), np.asarray(y_ref), atol=1e-4, rtol=1e-4)

    print("KERNEL_OK")
</pallas_src>

<mosaic_0001>
module attributes {stable_mosaic.version = 11 : i64} {
  func.func @_fused_pinn_kernel(%arg0: i32, %arg1: memref<1x256xf32, #tpu.memory_space<vmem>>, %arg2: memref<104x8xf32, #tpu.memory_space<vmem>>, %arg3: memref<104x104xf32, #tpu.memory_space<vmem>>, %arg4: memref<104x104xf32, #tpu.memory_space<vmem>>, %arg5: memref<8x104xf32, #tpu.memory_space<vmem>>, %arg6: memref<2x256xf32, #tpu.memory_space<vmem>>) attributes {dimension_semantics = [#tpu.dimension_semantics<parallel>], iteration_bounds = array<i64: 2>, scalar_prefetch = 0 : i64, scratch_operands = 0 : i64, tpu.core_type = #tpu.core_type<tc>, window_params = [{transform_indices = @transform_0, window_bounds = array<i64: 1, 256>}, {pipeline_mode = #tpu.pipeline_mode<synchronous>, transform_indices = @transform_1, window_bounds = array<i64: 104, 8>}, {pipeline_mode = #tpu.pipeline_mode<synchronous>, transform_indices = @transform_2, window_bounds = array<i64: 104, 104>}, {pipeline_mode = #tpu.pipeline_mode<synchronous>, transform_indices = @transform_3, window_bounds = array<i64: 104, 104>}, {pipeline_mode = #tpu.pipeline_mode<synchronous>, transform_indices = @transform_4, window_bounds = array<i64: 8, 104>}, {transform_indices = @transform_5, window_bounds = array<i64: 2, 256>}]} {
    %c0 = arith.constant 0 : index
    %c0_0 = arith.constant 0 : index
    %0 = vector.load %arg1[%c0, %c0_0] : memref<1x256xf32, #tpu.memory_space<vmem>>, vector<1x256xf32>
    %c0_1 = arith.constant 0 : index
    %c0_2 = arith.constant 0 : index
    %1 = vector.load %arg2[%c0_1, %c0_2] : memref<104x8xf32, #tpu.memory_space<vmem>>, vector<104x8xf32>
    %2 = vector.extract_strided_slice %1 {offsets = [0, 0], sizes = [104, 1], strides = [1, 1]} : vector<104x8xf32> to vector<104x1xf32>
    %3 = vector.extract_strided_slice %1 {offsets = [0, 1], sizes = [104, 1], strides = [1, 1]} : vector<104x8xf32> to vector<104x1xf32>
    %4 = vector.extract_strided_slice %1 {offsets = [0, 2], sizes = [104, 1], strides = [1, 1]} : vector<104x8xf32> to vector<104x1xf32>
    %5 = vector.extract_strided_slice %1 {offsets = [0, 3], sizes = [104, 1], strides = [1, 1]} : vector<104x8xf32> to vector<104x1xf32>
    %6 = vector.extract_strided_slice %1 {offsets = [0, 4], sizes = [2, 1], strides = [1, 1]} : vector<104x8xf32> to vector<2x1xf32>
    %7 = vector.broadcast %2 : vector<104x1xf32> to vector<104x256xf32>
    %8 = vector.broadcast %0 : vector<1x256xf32> to vector<104x256xf32>
    %9 = arith.mulf %7, %8 : vector<104x256xf32>
    %10 = vector.broadcast %3 : vector<104x1xf32> to vector<104x256xf32>
    %11 = arith.addf %9, %10 : vector<104x256xf32>
    %12 = math.tanh %11 : vector<104x256xf32>
    %c0_3 = arith.constant 0 : index
    %c0_4 = arith.constant 0 : index
    %13 = vector.load %arg3[%c0_3, %c0_4] : memref<104x104xf32, #tpu.memory_space<vmem>>, vector<104x104xf32>
    %cst = arith.constant dense<0.000000e+00> : vector<104x256xf32>
    %14 = tpu.matmul %13, %12, %cst {dimension_numbers = #tpu.dot_dimension_numbers<[1], [0], [0], [1], [0, 0, 1, 1], [], []>} : vector<104x104xf32>, vector<104x256xf32>, vector<104x256xf32> -> vector<104x256xf32>
    %15 = vector.broadcast %4 : vector<104x1xf32> to vector<104x256xf32>
    %16 = arith.addf %14, %15 : vector<104x256xf32>
    %17 = math.tanh %16 : vector<104x256xf32>
    %c0_5 = arith.constant 0 : index
    %c0_6 = arith.constant 0 : index
    %18 = vector.load %arg4[%c0_5, %c0_6] : memref<104x104xf32, #tpu.memory_space<vmem>>, vector<104x104xf32>
    %cst_7 = arith.constant dense<0.000000e+00> : vector<104x256xf32>
    %19 = tpu.matmul %18, %17, %cst_7 {dimension_numbers = #tpu.dot_dimension_numbers<[1], [0], [0], [1], [0, 0, 1, 1], [], []>} : vector<104x104xf32>, vector<104x256xf32>, vector<104x256xf32> -> vector<104x256xf32>
    %20 = vector.broadcast %5 : vector<104x1xf32> to vector<104x256xf32>
    %21 = arith.addf %19, %20 : vector<104x256xf32>
    %22 = math.tanh %21 : vector<104x256xf32>
    %c0_8 = arith.constant 0 : index
    %c0_9 = arith.constant 0 : index
    %23 = vector.load %arg5[%c0_8, %c0_9] : memref<8x104xf32, #tpu.memory_space<vmem>>, vector<8x104xf32>
    %cst_10 = arith.constant dense<0.000000e+00> : vector<8x256xf32>
    %24 = tpu.matmul %23, %22, %cst_10 {dimension_numbers = #tpu.dot_dimension_numbers<[1], [0], [0], [1], [0, 0, 1, 1], [], []>} : vector<8x104xf32>, vector<104x256xf32>, vector<8x256xf32> -> vector<8x256xf32>
    %25 = vector.extract_strided_slice %24 {offsets = [0, 0], sizes = [2, 256], strides = [1, 1]} : vector<8x256xf32> to vector<2x256xf32>
    %26 = vector.broadcast %6 : vector<2x1xf32> to vector<2x256xf32>
    %27 = arith.addf %25, %26 : vector<2x256xf32>
    %c0_11 = arith.constant 0 : index
    %c0_12 = arith.constant 0 : index
    %28 = vector.load %arg6[%c0_11, %c0_12] : memref<2x256xf32, #tpu.memory_space<vmem>>, vector<2x256xf32>
    tpu.vector_store %arg6[%c0_11, %c0_12], %27 {strides = array<i32>} : memref<2x256xf32, #tpu.memory_space<vmem>>, vector<2x256xf32>,
    return
  }
  func.func @transform_0(%arg0: i32) -> (i32, i32) {
    %c0_i32 = arith.constant 0 : i32
    %c0_i32_0 = arith.constant 0 : i32
    return %c0_i32, %arg0 : i32, i32
  }
  func.func @transform_1(%arg0: i32) -> (i32, i32) {
    %c0_i32 = arith.constant 0 : i32
    %c0_i32_0 = arith.constant 0 : i32
    %c0_i32_1 = arith.constant 0 : i32
    return %c0_i32, %c0_i32_0 : i32, i32
  }
  func.func @transform_2(%arg0: i32) -> (i32, i32) {
    %c0_i32 = arith.constant 0 : i32
    %c0_i32_0 = arith.constant 0 : i32
    %c0_i32_1 = arith.constant 0 : i32
    return %c0_i32, %c0_i32_0 : i32, i32
  }
  func.func @transform_3(%arg0: i32) -> (i32, i32) {
    %c0_i32 = arith.constant 0 : i32
    %c0_i32_0 = arith.constant 0 : i32
    %c0_i32_1 = arith.constant 0 : i32
    return %c0_i32, %c0_i32_0 : i32, i32
  }
  func.func @transform_4(%arg0: i32) -> (i32, i32) {
    %c0_i32 = arith.constant 0 : i32
    %c0_i32_0 = arith.constant 0 : i32
    %c0_i32_1 = arith.constant 0 : i32
    return %c0_i32, %c0_i32_0 : i32, i32
  }
  func.func @transform_5(%arg0: i32) -> (i32, i32) {
    %c0_i32 = arith.constant 0 : i32
    %c0_i32_0 = arith.constant 0 : i32
    return %c0_i32, %arg0 : i32, i32
  }
}

</mosaic_0001>

<bundles_post_ra>
// kernel: pinn_forward.1
= control target key start
LH: loop header
LB: loop body
LE: loop exit
PB: predicated region body
PF: predicated region fallthrough
CT: control target
= control target key end

     0   :  { %10 = vsyncpa [#allocation3], 0  ;;  %s1414_s18 = smov 0   ;;  %s1755_s0 = inlined_call_operand.vmem [shape: f32[1,512], index: 0, kind: input, shape index: {}]   ;;  %s1756_s1 = inlined_call_operand.vmem [shape: f32[104,8], index: 1, kind: input, shape index: {}]   ;;  %s1757_s2 = inlined_call_operand.vmem [shape: f32[104,104], index: 2, kind: input, shape index: {}]   ;;  %s1758_s3 = inlined_call_operand.hbm [shape: f32[104,104], index: 3, kind: input, shape index: {}]   ;;  %s1759_s4 = inlined_call_operand.vmem [shape: f32[8,104], index: 4, kind: input, shape index: {}]   ;;  %s1760_s5 = inlined_call_operand.vmem [shape: f32[2,512], index: 5, kind: output, shape index: {}]  }
   0x1 LB: > { %s174_s21 = sshll.u32 %s1758_s3, 4  ;;  %s1063_s22 = sadd.s32 4294967295, %s1374_s18   ;;  %s1374_s18 = sphi %s1414_s18, %s16_s18   ;;  %s175_s21 = int_to_ptr.hbm [resolvable:$true] %s174_s21 }
   0x2   : > { %p1065_p0 = scmp.ge.s32.totalorder %s1374_s18, 1  ;;  %p157_p1 = scmp.lt.s32.totalorder %s1374_s18, 3 }
   0x3   : > { %p1137_p2 = scmp.eq.s32.totalorder %s1063_s22, 0  ;;  %s1376_s23 = smov [#allocation2]  }
   0x4   : > { %p158_p3 = pnand %p1065_p0, %p157_p1  ;;  %s176_s24 = sshll.u32 %s1376_s23, 4  ;;  %s177_s24 = int_to_ptr.vmem [resolvable:$true] %s176_s24 }
   0x5   : > { %s1377_s25 = smov 128   ;;  %s1378_s26 = smov 8  }
   0x6   : > { %p1133_p4 = pneg %p158_p3  ;;  %203 = sbr.rel (%p158_p3) target bundleno = 868 (0x364), region = 40 }
   0x8   : > { %p1134_p5 = pnand %p1137_p2, %p1133_p4 }
   0xa   : > { %1136 = dma.hbm_to_vmem [thread:$0]  (!%p1134_p5), %s175_s21, 1664, %s177_s24, [#allocation3], %s1377_s25, %s1377_s25, %s1378_s26  }
   0xb   : > { %1369 = dma.done.wait (%p1137_p2), [#allocation3], 1664  }
   0xc   : > { %1371 = vsyncadd (%p1137_p2), [#allocation3], 4294965632  ;;  %v1379_v0 = vmov 1   ;;  %v1380_v1 = vmov 0   ;;  %v1430_v2 = vld [vmem:[%s1756_s1 + $0x60] sm:$0xff]  ;;  %v1435_v3 = vld [vmem:[%s1756_s1 + $0x58] sm:$0xff] }
   0xd   : > { %1156 = vset.pattern.permute.xlu1 %v1379_v0  ;;  %1155 = vset.pattern.permute.xlu0 %v1380_v1  ;;  %v1443_v4 = vld [vmem:[%s1756_s1 + $0x50] sm:$0xff]  ;;  %v1448_v5 = vld [vmem:[%s1756_s1 + $0x48] sm:$0xff]  ;;  %v1461_v7 = vld [vmem:[%s1756_s1 + $0x40] sm:$0xff]  ;;  %s1070_s30 = sshll.u32 %s1063_s22, 1  ;;  %v1381_v58 = vmov 2   ;;  %vm521_vm0 = vcmask 850944  }
   0xe   : > { %1158 = vset.pattern.permute.xlu2 %v1379_v0  ;;  %401 = vperm.xlu1 %1156, %v1430_v2   ;;  %v1456_v6 = vld [vmem:[%s1756_s1 + $0x30] sm:$0xff]  ;;  %v1469_v8 = vld [vmem:[%s1756_s1 + $0x38] sm:$0xff]  ;;  %v1477_v9 = vld [vmem:[%s1756_s1 + $0x28] sm:$0xff]  ;;  %p232_p6 = scmp.lt.s32.totalorder %s1070_s30, 3  ;;  %vm994_vm1 = vcmask 1041408  }
   0xf   : > { %318 = vperm.xlu0 %1155, %v1430_v2   ;;  %397 = vperm.xlu2 %1158, %v1435_v3   ;;  %v1485_v10 = vld [vmem:[%s1756_s1 + $0x8] sm:$0xff]  ;;  %v1490_v11 = vld [vmem:[%s1756_s1 + $0x20] sm:$0xff]  ;;  %v1498_v12 = vld [vmem:[%s1756_s1 + $0x18] sm:$0xff] }
  0x10   : > { %v1505_v13 = vld [vmem:[%s1756_s1 + $0x10] sm:$0xff]  ;;  %v1512_v14 = vld [vmem:[%s1756_s1] sm:$0xff]  ;;  %s1762_s30 = smov (!%p232_p6, %s1070_s30), 3 }
  0x11   : > { %s234_s8 = scalar_lea.vmem %s1755_s0, %s1762_s30  ;;  %s1072_s13 = sshll.u32 %s1762_s30, 1 }
  0x12   : > { %v242_v17 = vld [vmem:[%s234_s8] sm:$0x3]  ;;  %s240_s16 = scalar_lea.vmem %s1760_s5, %s1072_s13 }
  0x13   : > { %v1526_v18 = vperm.slane %v242_v17, 0  ;;  %v1528_v19 = vperm.slane %v242_v17, 1 }
  0x16   : > { %1157 = vset.pattern.permute.xlu1 %v1380_v1 }
  0x17   : > { %313 = vperm.xlu0 %1155, %v1435_v3   ;;  %308 = vperm.xlu1 %1157, %v1443_v4  }
  0x18   : > { %1159 = vset.pattern.permute.xlu2 %v1380_v1 }
  0x19   : > { %303 = vperm.xlu2 %1159, %v1448_v5  }
  0x1f   : > { %288 = vperm.xlu0 %1155, %v1456_v6   ;;  %298 = vperm.xlu1 %1157, %v1461_v7  }
  0x21   : > { %1160 = vset.pattern.permute.xlu2 %v1379_v0 }
  0x22   : > { %389 = vperm.xlu2 %1160, %v1448_v5  }
  0x27   : > { %1161 = vset.pattern.permute.xlu0 %v1379_v0  ;;  %293 = vperm.xlu1 %1157, %v1469_v8  }
  0x28   : > { %393 = vperm.xlu0 %1161, %v1443_v4  }
  0x2a   : > { %385 = vperm.xlu2 %1160, %v1461_v7  }
  0x2f   : > { %1162 = vset.pattern.permute.xlu1 %v1379_v0 }
  0x30   : > { %373 = vperm.xlu0 %1161, %v1477_v9   ;;  %381 = vperm.xlu1 %1162, %v1469_v8  }
  0x32   : > { %1163 = vset.pattern.permute.xlu2 %v1380_v1 }
  0x33   : > { %283 = vperm.xlu2 %1163, %v1477_v9  }
  0x38   : > { %1166 = vset.pattern.permute.xlu0 %v1380_v1  ;;  %377 = vperm.xlu1 %1162, %v1456_v6  }
  0x39   : > { %263 = vperm.xlu0 %1166, %v1485_v10  }
  0x3b   : > { %278 = vperm.xlu2 %1163, %v1490_v11  }
  0x40   : > { %1164 = vset.pattern.permute.xlu1 %v1380_v1 }
  0x41   : > { %273 = vperm.xlu1 %1164, %v1498_v12   ;;  %1170 = vset.pattern.permute.xlu0 %v1381_v58 }
  0x42   : > { %518 = vperm.xlu0 %1170, %v1430_v2  }
  0x43   : > { %1165 = vset.pattern.permute.xlu2 %v1379_v0 }
  0x44   : > { %369 = vperm.xlu2 %1165, %v1490_v11  }
  0x49   : > { %268 = vperm.xlu1 %1164, %v1505_v13  }
  0x4a   : > { %498 = vperm.xlu0 %1170, %v1469_v8  }
  0x4c   : > { %365 = vperm.xlu2 %1165, %v1498_v12  }
  0x51   : > { %1167 = vset.pattern.permute.xlu1 %v1379_v0 }
  0x52   : > { %361 = vperm.xlu1 %1167, %v1505_v13   ;;  %486 = vperm.xlu0 %1170, %v1490_v11  }
  0x54   : > { %1168 = vset.pattern.permute.xlu2 %v1380_v1 }
  0x55   : > { %258 = vperm.xlu2 %1168, %v1512_v14  }
  0x5a   : > { %357 = vperm.xlu1 %1167, %v1485_v10   ;;  %474 = vperm.xlu0 %1170, %v1485_v10  }
  0x5d   : > { %1169 = vset.pattern.permute.xlu2 %v1379_v0 }
  0x5e   : > { %353 = vperm.xlu2 %1169, %v1512_v14  }
  0x62   : > { %1171 = vset.pattern.permute.xlu1 %v1381_v58 }
  0x63   : > { %514 = vperm.xlu1 %1171, %v1435_v3  }
  0x66   : > { %1172 = vset.pattern.permute.xlu2 %v1381_v58 }
  0x67   : > { %510 = vperm.xlu2 %1172, %v1443_v4  }
  0x69   : > { %v398_v15 = vpop.permute.xlu2 %397 }
  0x6b   : > { %506 = vperm.xlu1 %1171, %v1448_v5  }
  0x6f   : > { %502 = vperm.xlu2 %1172, %v1461_v7  }
  0x73   : > { %v304_v16 = vpop.permute.xlu2 %303  ;;  %494 = vperm.xlu1 %1171, %v1456_v6  }
  0x74   : > { %v344_v40 = vmul.f32 %v1526_v18, %v304_v16  ;;  %v345_v42 = vmul.f32 %v1528_v19, %v304_v16 }
  0x77   : > { %490 = vperm.xlu2 %1172, %v1477_v9  }
  0x7b   : > { %482 = vperm.xlu1 %1171, %v1498_v12  }
  0x7c   : > { %v390_v24 = vpop.permute.xlu2 %389 }
  0x7d   : > { %v422_v49 = vadd.f32 %v390_v24, %v344_v40  ;;  %v423_v52 = vadd.f32 %v390_v24, %v345_v42 }
  0x7f   : > { %478 = vperm.xlu2 %1172, %v1505_v13  }
  0x80   : > { %v402_v20 = vpop.permute.xlu1 %401 }
  0x81   : > { %v319_v21 = vpop.permute.xlu0 %318 }
  0x82   : > { %v350_v22 = vmul.f32 %v1526_v18, %v319_v21  ;;  %v351_v23 = vmul.f32 %v1528_v19, %v319_v21 }
  0x83   : > { %470 = vperm.xlu1 %1171, %v1512_v14  }
  0x84   : > { %v428_v25 = vadd.f32 %v402_v20, %v350_v22  ;;  %v429_v26 = vadd.f32 %v402_v20, %v351_v23  ;;  %v386_v35 = vpop.permute.xlu2 %385 }
  0x86   : > { %1178 = vtanh.f32 %v428_v25 }
  0x87   : > { %1180 = vtanh.f32 %v429_v26 }
  0x89   : > { %v314_v27 = vpop.permute.xlu0 %313  ;;  %v309_v30 = vpop.permute.xlu1 %308 }
  0x8a   : > { %v348_v28 = vmul.f32 %v1526_v18, %v314_v27  ;;  %v349_v29 = vmul.f32 %v1528_v19, %v314_v27  ;;  %v346_v43 = vmul.f32 %v1526_v18, %v309_v30  ;;  %v347_v44 = vmul.f32 %v1528_v19, %v309_v30 }
  0x8c   : > { %v1179_v31 = vpop.eup %1178  ;;  %v426_v32 = vadd.f32 %v398_v15, %v348_v28  ;;  %v427_v33 = vadd.f32 %v398_v15, %v349_v29 }
  0x8d   : > { %v1181_v34 = vpop.eup %1180  ;;  %564 = vmatpush.msra.mxu0 %v1179_v31  ;;  %v284_v41 = vpop.permute.xlu2 %283 }
  0x8e   : > { %1182 = vtanh.f32 %v426_v32  ;;  %620 = vmatpush.msra.mxu1 %v1181_v34  ;;  %v336_v17 = vmul.f32 %v1526_v18, %v284_v41  ;;  %v337_v20 = vmul.f32 %v1528_v19, %v284_v41 }
  0x8f   : > { %1184 = vtanh.f32 %v427_v33 }
  0x91   : > { %v289_v36 = vpop.permute.xlu0 %288  ;;  %v299_v37 = vpop.permute.xlu1 %298 }
  0x92   : > { %v342_v45 = vmul.f32 %v1526_v18, %v299_v37  ;;  %v343_v46 = vmul.f32 %v1528_v19, %v299_v37  ;;  %v338_v22 = vmul.f32 %v1526_v18, %v289_v36  ;;  %v339_v23 = vmul.f32 %v1528_v19, %v289_v36 }
  0x94   : > { %v1183_v38 = vpop.eup %1182  ;;  %v420_v53 = vadd.f32 %v386_v35, %v342_v45  ;;  %v421_v54 = vadd.f32 %v386_v35, %v343_v46 }
  0x95   : > { %v1185_v39 = vpop.eup %1184  ;;  %565 = vmatpush.msra.mxu0 %v1183_v38  ;;  %v279_v55 = vpop.permute.xlu2 %278 }
  0x96   : > { %621 = vmatpush.msra.mxu1 %v1185_v39  ;;  %v334_v24 = vmul.f32 %v1526_v18, %v279_v55  ;;  %v335_v25 = vmul.f32 %v1528_v19, %v279_v55 }
  0x99   : > { %v294_v47 = vpop.permute.xlu1 %293 }
  0x9a   : > { %v394_v48 = vpop.permute.xlu0 %393  ;;  %v340_v56 = vmul.f32 %v1526_v18, %v294_v47  ;;  %v341_v57 = vmul.f32 %v1528_v19, %v294_v47 }
  0x9b   : > { %v424_v50 = vadd.f32 %v394_v48, %v346_v43  ;;  %v425_v51 = vadd.f32 %v394_v48, %v347_v44 }
  0x9d   : > { %1186 = vtanh.f32 %v424_v50 }
  0x9e   : > { %1188 = vtanh.f32 %v425_v51  ;;  %v370_v26 = vpop.permute.xlu2 %369 }
  0x9f   : > { %1190 = vtanh.f32 %v422_v49  ;;  %v412_v34 = vadd.f32 %v370_v26, %v334_v24  ;;  %v413_v35 = vadd.f32 %v370_v26, %v335_v25  ;;  %v457_v24 = vld [vmem:[%s1757_s2 + $0x8] sm:$0xff]  ;;  %v458_v25 = vld [vmem:[%s1757_s2 + $0x10] sm:$0xff]  ;;  %v459_v26 = vld [vmem:[%s1757_s2 + $0x18] sm:$0xff] }
  0xa0   : > { %1192 = vtanh.f32 %v423_v52 }
  0xa1   : > { %1194 = vtanh.f32 %v420_v53 }
  0xa2   : > { %1196 = vtanh.f32 %v421_v54  ;;  %v382_v60 = vpop.permute.xlu1 %381  ;;  %v374_v21 = vpop.permute.xlu0 %373 }
  0xa3   : > { %v1187_v59 = vpop.eup %1186  ;;  %v418_v62 = vadd.f32 %v382_v60, %v340_v56  ;;  %v419_v63 = vadd.f32 %v382_v60, %v341_v57  ;;  %v414_v29 = vadd.f32 %v374_v21, %v336_v17  ;;  %v415_v33 = vadd.f32 %v374_v21, %v337_v20 }
  0xa4   : > { %v1189_v61 = vpop.eup %1188  ;;  %566 = vmatpush.msra.mxu0 %v1187_v59 }
  0xa5   : > { %v1191_v0 = vpop.eup %1190  ;;  %622 = vmatpush.msra.mxu1 %v1189_v61  ;;  %1198 = vtanh.f32 %v418_v62 }
  0xa6   : > { %v1193_v1 = vpop.eup %1192  ;;  %567 = vmatpush.msra.mxu0 %v1191_v0  ;;  %1200 = vtanh.f32 %v419_v63  ;;  %v366_v38 = vpop.permute.xlu2 %365 }
  0xa7   : > { %v1195_v15 = vpop.eup %1194  ;;  %623 = vmatpush.msra.mxu1 %v1193_v1 }
  0xa8   : > { %v1197_v16 = vpop.eup %1196  ;;  %568 = vmatpush.msra.mxu0 %v1195_v15 }
  0xa9   : > { %624 = vmatpush.msra.mxu1 %v1197_v16 }
  0xaa   : > { %v378_v27 = vpop.permute.xlu1 %377 }
  0xab   : > { %v1199_v28 = vpop.eup %1198  ;;  %v416_v30 = vadd.f32 %v378_v27, %v338_v22  ;;  %v417_v31 = vadd.f32 %v378_v27, %v339_v23  ;;  %v264_v57 = vpop.permute.xlu0 %263  ;;  %v460_v27 = vld [vmem:[%s1757_s2 + $0x20] sm:$0xff] }
  0xac   : > { %v1201_v32 = vpop.eup %1200  ;;  %569 = vmatpush.msra.mxu0 %v1199_v28  ;;  %v328_v59 = vmul.f32 %v1526_v18, %v264_v57  ;;  %v329_v60 = vmul.f32 %v1528_v19, %v264_v57  ;;  %v461_v28 = vld [vmem:[%s1757_s2 + $0x28] sm:$0xff] }
  0xad   : > { %1202 = vtanh.f32 %v416_v30  ;;  %625 = vmatpush.msra.mxu1 %v1201_v32  ;;  %v463_v30 = vld [vmem:[%s1757_s2 + $0x38] sm:$0xff]  ;;  %v465_v32 = vld [vmem:[%s1757_s2 + $0x48] sm:$0xff] }
  0xae   : > { %1204 = vtanh.f32 %v417_v31  ;;  %v464_v31 = vld [vmem:[%s1757_s2 + $0x40] sm:$0xff] }
  0xaf   : > { %1206 = vtanh.f32 %v414_v29  ;;  %v259_v51 = vpop.permute.xlu2 %258  ;;  %v462_v29 = vld [vmem:[%s1757_s2 + $0x30] sm:$0xff] }
  0xb0   : > { %1208 = vtanh.f32 %v415_v33  ;;  %v326_v58 = vmul.f32 %v1526_v18, %v259_v51  ;;  %v327_v61 = vmul.f32 %v1528_v19, %v259_v51  ;;  %v466_v33 = vld [vmem:[%s1757_s2 + $0x50] sm:$0xff] }
  0xb1   : > { %1210 = vtanh.f32 %v412_v34  ;;  %v467_v34 = vld [vmem:[%s1757_s2 + $0x58] sm:$0xff] }
  0xb2   : > { %1212 = vtanh.f32 %v413_v35  ;;  %v468_v35 = vld [vmem:[%s1757_s2 + $0x60] sm:$0xff] }
  0xb3   : > { %v1203_v36 = vpop.eup %1202  ;;  %v274_v37 = vpop.permute.xlu1 %273 }
  0xb4   : > { %v1205_v39 = vpop.eup %1204  ;;  %v332_v40 = vmul.f32 %v1526_v18, %v274_v37  ;;  %v333_v41 = vmul.f32 %v1528_v19, %v274_v37  ;;  %570 = vmatpush.msra.mxu0 %v1203_v36 }
  0xb5   : > { %v1207_v42 = vpop.eup %1206  ;;  %626 = vmatpush.msra.mxu1 %v1205_v39 }
  0xb6   : > { %v1209_v43 = vpop.eup %1208  ;;  %v410_v44 = vadd.f32 %v366_v38, %v332_v40  ;;  %v411_v45 = vadd.f32 %v366_v38, %v333_v41  ;;  %571 = vmatpush.msra.mxu0 %v1207_v42 }
  0xb7   : > { %v1211_v46 = vpop.eup %1210  ;;  %627 = vmatpush.msra.mxu1 %v1209_v43 }
  0xb8   : > { %v1213_v47 = vpop.eup %1212  ;;  %1214 = vtanh.f32 %v410_v44  ;;  %572 = vmatpush.msra.mxu0 %v1211_v46  ;;  %v354_v62 = vpop.permute.xlu2 %353 }
  0xb9   : > { %1216 = vtanh.f32 %v411_v45  ;;  %628 = vmatpush.msra.mxu1 %v1213_v47  ;;  %v404_v1 = vadd.f32 %v354_v62, %v326_v58  ;;  %v405_v20 = vadd.f32 %v354_v62, %v327_v61 }
  0xbb   : > { %v269_v48 = vpop.permute.xlu1 %268 }
  0xbc   : > { %v330_v52 = vmul.f32 %v1526_v18, %v269_v48  ;;  %v331_v53 = vmul.f32 %v1528_v19, %v269_v48  ;;  %v456_v19 = vld [vmem:[%s1757_s2] sm:$0xff] }
  0xbe   : > { %v1215_v49 = vpop.eup %1214 }
  0xbf   : > { %v1217_v50 = vpop.eup %1216  ;;  %573 = vmatpush.msra.mxu0 %v1215_v49 }
  0xc0   : > { %629 = vmatpush.msra.mxu1 %v1217_v50 }
  0xc4   : > { %v362_v54 = vpop.permute.xlu1 %361 }
  0xc5   : > { %v408_v55 = vadd.f32 %v362_v54, %v330_v52  ;;  %v409_v56 = vadd.f32 %v362_v54, %v331_v53 }
  0xc7   : > { %1218 = vtanh.f32 %v408_v55 }
  0xc8   : > { %1220 = vtanh.f32 %v409_v56 }
  0xcc   : > { %v358_v63 = vpop.permute.xlu1 %357 }
  0xcd   : > { %v1219_v0 = vpop.eup %1218  ;;  %v406_v15 = vadd.f32 %v358_v63, %v328_v59  ;;  %v407_v16 = vadd.f32 %v358_v63, %v329_v60  ;;  %v511_v59 = vpop.permute.xlu2 %510 }
  0xce   : > { %v1221_v17 = vpop.eup %1220  ;;  %574 = vmatpush.msra.mxu0 %v1219_v0  ;;  %v519_v60 = vpop.permute.xlu0 %518  ;;  %v1382_v0 = vmov 3  }
  0xcf   : > { %1222 = vtanh.f32 %v406_v15  ;;  %630 = vmatpush.msra.mxu1 %v1221_v17  ;;  %1174 = vset.pattern.permute.xlu0 %v1382_v0 }
  0xd0   : > { %1224 = vtanh.f32 %v407_v16  ;;  %1175 = vset.pattern.permute.xlu1 %v1382_v0  ;;  %757 = vperm.xlu0 %1174, %v1435_v3  }
  0xd1   : > { %1226 = vtanh.f32 %v404_v1  ;;  %753 = vperm.xlu1 %1175, %v1443_v4   ;;  %1173 = vset.pattern.permute.xlu2 %v1382_v0  ;;  %v699_v0 = vld [vmem:[#allocation2] sm:$0xff] }
  0xd2   : > { %1228 = vtanh.f32 %v405_v20  ;;  %761 = vperm.xlu2 %1173, %v1430_v2  }
  0xd5   : > { %v1223_v21 = vpop.eup %1222  ;;  %v515_v56 = vpop.permute.xlu1 %514 }
  0xd6   : > { %v1225_v18 = vpop.eup %1224  ;;  %575 = vmatpush.msra.mxu0 %v1223_v21  ;;  %v503_v1 = vpop.permute.xlu2 %502 }
  0xd7   : > { %v1227_v22 = vpop.eup %1226  ;;  %631 = vmatpush.msra.mxu1 %v1225_v18  ;;  %v499_v15 = vpop.permute.xlu0 %498 }
  0xd8   : > { %v1229_v23 = vpop.eup %1228  ;;  %576 = vmatpush.msra.mxu0 %v1227_v22  ;;  %737 = vperm.xlu0 %1174, %v1456_v6  }
  0xd9   : > { %632 = vmatpush.msra.mxu1 %v1229_v23  ;;  %1073 = vmatmul.msk.f32.vlgmr.msra.gmra.mxu0 %vm521_vm0, %v456_v19 }
  0xda   : > { %1086 = vmatmul.msk.f32.vlgmr.msra.gmra.mxu1 %vm521_vm0, %v456_v19  ;;  %745 = vperm.xlu1 %1175, %v1461_v7  }
  0xdb   : > { %749 = vperm.xlu2 %1173, %v1448_v5  }
  0xdd   : > { %v507_v61 = vpop.permute.xlu1 %506 }
  0xde   : > { %v491_v2 = vpop.permute.xlu2 %490 }
  0xe0   : > { %725 = vperm.xlu0 %1174, %v1498_v12  }
  0xe1   : > { %1074 = vmatmul.msk.f32.gmra.mxu0 %vm521_vm0, %v457_v24 }
  0xe2   : > { %1087 = vmatmul.msk.f32.gmra.mxu1 %vm521_vm0, %v457_v24  ;;  %733 = vperm.xlu1 %1175, %v1477_v9  }
  0xe3   : > { %741 = vperm.xlu2 %1173, %v1469_v8  }
  0xe5   : > { %v495_v17 = vpop.permute.xlu1 %494 }
  0xe8   : > { %713 = vperm.xlu0 %1174, %v1512_v14  }
  0xe9   : > { %1075 = vmatmul.msk.f32.gmra.mxu0 %vm521_vm0, %v458_v25 }
  0xea   : > { %1088 = vmatmul.msk.f32.gmra.mxu1 %vm521_vm0, %v458_v25  ;;  %721 = vperm.xlu1 %1175, %v1505_v13  }
  0xeb   : > { %729 = vperm.xlu2 %1173, %v1490_v11  }
  0xf1   : > { %1076 = vmatmul.msk.f32.gmra.mxu0 %vm521_vm0, %v459_v26 }
  0xf2   : > { %1089 = vmatmul.msk.f32.gmra.mxu1 %vm521_vm0, %v459_v26 }
  0xf3   : > { %717 = vperm.xlu2 %1173, %v1485_v10   ;;  %v702_v10 = vld [vmem:[#allocation2 + $0x18] sm:$0xff] }
  0xf9   : > { %1077 = vmatmul.msk.f32.gmra.mxu0 %vm521_vm0, %v460_v27 }
  0xfa   : > { %1090 = vmatmul.msk.f32.gmra.mxu1 %vm521_vm0, %v460_v27 }
 0x101   : > { %1078 = vmatmul.msk.f32.gmra.mxu0 %vm521_vm0, %v461_v28 }
 0x102   : > { %1091 = vmatmul.msk.f32.gmra.mxu1 %vm521_vm0, %v461_v28  ;;  %v487_v28 = vpop.permute.xlu0 %486 }
 0x109   : > { %1079 = vmatmul.msk.f32.gmra.mxu0 %vm521_vm0, %v462_v29 }
 0x10a   : > { %1092 = vmatmul.msk.f32.gmra.mxu1 %vm521_vm0, %v462_v29 }
 0x111   : > { %1080 = vmatmul.msk.f32.gmra.mxu0 %vm521_vm0, %v463_v30 }
 0x112   : > { %1093 = vmatmul.msk.f32.gmra.mxu1 %vm521_vm0, %v463_v30 }
 0x119   : > { %1081 = vmatmul.msk.f32.gmra.mxu0 %vm521_vm0, %v464_v31 }
 0x11a   : > { %1094 = vmatmul.msk.f32.gmra.mxu1 %vm521_vm0, %v464_v31 }
 0x121   : > { %1082 = vmatmul.msk.f32.gmra.mxu0 %vm521_vm0, %v465_v32 }
 0x122   : > { %1095 = vmatmul.msk.f32.gmra.mxu1 %vm521_vm0, %v465_v32  ;;  %v483_v32 = vpop.permute.xlu1 %482 }
 0x129   : > { %1083 = vmatmul.msk.f32.gmra.mxu0 %vm521_vm0, %v466_v33 }
 0x12a   : > { %1096 = vmatmul.msk.f32.gmra.mxu1 %vm521_vm0, %v466_v33 }
 0x131   : > { %1084 = vmatmul.msk.f32.gmra.mxu0 %vm521_vm0, %v467_v34 }
 0x132   : > { %1097 = vmatmul.msk.f32.gmra.mxu1 %vm521_vm0, %v467_v34 }
 0x139   : > { %1085 = vmatmul.msk.f32.gmra.mxu0 %vm521_vm0, %v468_v35 }
 0x13a   : > { %1098 = vmatmul.msk.f32.gmra.mxu1 %vm521_vm0, %v468_v35 }
 0x156   : > { %v1634_v36 = vpop.f32.mrf.mxu0 }
 0x157   : > { %v1636_v37 = vpop.f32.mrf.mxu1 }
 0x15e   : > { %v1638_v38 = vpop.f32.mrf.mxu0 }
 0x15f   : > { %v1640_v39 = vpop.f32.mrf.mxu1 }
 0x166   : > { %v1642_v40 = vpop.f32.mrf.mxu0 }
 0x167   : > { %v1644_v41 = vpop.f32.mrf.mxu1 }
 0x16e   : > { %v1646_v42 = vpop.f32.mrf.mxu0 }
 0x16f   : > { %v1648_v43 = vpop.f32.mrf.mxu1 }
 0x170   : > { %v644_v9 = vadd.f32 %v1648_v43, %v483_v32 }
 0x176   : > { %v1650_v44 = vpop.f32.mrf.mxu0 }
 0x177   : > { %v1652_v45 = vpop.f32.mrf.mxu1 }
 0x17e   : > { %v1654_v46 = vpop.f32.mrf.mxu0 }
 0x17f   : > { %v1656_v47 = vpop.f32.mrf.mxu1  ;;  %v594_v35 = vadd.f32 %v1654_v46, %v491_v2  ;;  %v647_v46 = vadd.f32 %v1652_v45, %v487_v28 }
 0x186   : > { %v596_v48 = vpop.f32.mrf.mxu0 }
 0x187   : > { %v652_v49 = vpop.f32.mrf.mxu1  ;;  %v597_v7 = vadd.f32 %v596_v48, %v495_v17 }
 0x188   : > { %v653_v34 = vadd.f32 %v652_v49, %v495_v17  ;;  %v701_v17 = vld [vmem:[#allocation2 + $0x10] sm:$0xff] }
 0x18e   : > { %v599_v50 = vpop.f32.mrf.mxu0 }
 0x18f   : > { %v655_v51 = vpop.f32.mrf.mxu1  ;;  %v600_v29 = vadd.f32 %v599_v50, %v499_v15 }
 0x190   : > { %v656_v31 = vadd.f32 %v655_v51, %v499_v15  ;;  %v650_v51 = vadd.f32 %v1656_v47, %v491_v2  ;;  %v588_v47 = vadd.f32 %v1646_v42, %v483_v32  ;;  %v471_v42 = vpop.permute.xlu1 %470 }
 0x196   : > { %v602_v52 = vpop.f32.mrf.mxu0 }
 0x197   : > { %v658_v53 = vpop.f32.mrf.mxu1  ;;  %v603_v4 = vadd.f32 %v602_v52, %v503_v1  ;;  %v591_v52 = vadd.f32 %v1650_v44, %v487_v28 }
 0x198   : > { %v659_v26 = vadd.f32 %v658_v53, %v503_v1  ;;  %v479_v53 = vpop.permute.xlu2 %478 }
 0x199   : > { %v585_v8 = vadd.f32 %v1642_v40, %v479_v53 }
 0x19e   : > { %v605_v54 = vpop.f32.mrf.mxu0 }
 0x19f   : > { %v661_v55 = vpop.f32.mrf.mxu1  ;;  %v606_v25 = vadd.f32 %v605_v54, %v507_v61 }
 0x1a0   : > { %v662_v3 = vadd.f32 %v661_v55, %v507_v61  ;;  %v475_v55 = vpop.permute.xlu0 %474 }
 0x1a6   : > { %v608_v57 = vpop.f32.mrf.mxu0 }
 0x1a7   : > { %v664_v58 = vpop.f32.mrf.mxu1  ;;  %v609_v23 = vadd.f32 %v608_v57, %v511_v59 }
 0x1a8   : > { %v665_v24 = vadd.f32 %v664_v58, %v511_v59  ;;  %v582_v58 = vadd.f32 %v1638_v38, %v475_v55  ;;  %v638_v59 = vadd.f32 %v1640_v39, %v475_v55  ;;  %v635_v38 = vadd.f32 %v1636_v37, %v471_v42 }
 0x1ae   : > { %v611_v62 = vpop.f32.mrf.mxu0 }
 0x1af   : > { %v667_v63 = vpop.f32.mrf.mxu1  ;;  %v612_v20 = vadd.f32 %v611_v62, %v515_v56 }
 0x1b0   : > { %v668_v19 = vadd.f32 %v667_v63, %v515_v56  ;;  %v641_v56 = vadd.f32 %v1644_v41, %v479_v53  ;;  %v579_v41 = vadd.f32 %v1634_v36, %v471_v42 }
 0x1b6   : > { %v614_v16 = vpop.f32.mrf.mxu0 }
 0x1b7   : > { %v615_v21 = vadd.f32 %v614_v16, %v519_v60  ;;  %v670_v18 = vpop.f32.mrf.mxu1  ;;  %v700_v16 = vld [vmem:[#allocation2 + $0x8] sm:$0xff] }
 0x1b8   : > { %v671_v22 = vadd.f32 %v670_v18, %v519_v60  ;;  %v705_v18 = vld [vmem:[#allocation2 + $0x30] sm:$0xff] }
 0x1b9   : > { %1230 = vtanh.f32 %v615_v21  ;;  %v704_v21 = vld [vmem:[#allocation2 + $0x28] sm:$0xff] }
 0x1ba   : > { %1232 = vtanh.f32 %v671_v22  ;;  %v707_v22 = vld [vmem:[#allocation2 + $0x40] sm:$0xff] }
 0x1bb   : > { %1234 = vtanh.f32 %v612_v20  ;;  %v703_v20 = vld [vmem:[#allocation2 + $0x20] sm:$0xff] }
 0x1bc   : > { %1236 = vtanh.f32 %v668_v19  ;;  %v706_v19 = vld [vmem:[#allocation2 + $0x38] sm:$0xff] }
 0x1bd   : > { %1238 = vtanh.f32 %v609_v23  ;;  %v708_v23 = vld [vmem:[#allocation2 + $0x48] sm:$0xff] }
 0x1be   : > { %1240 = vtanh.f32 %v665_v24  ;;  %v709_v24 = vld [vmem:[#allocation2 + $0x50] sm:$0xff] }
 0x1bf   : > { %v1231_v27 = vpop.eup %1230  ;;  %1242 = vtanh.f32 %v606_v25  ;;  %v710_v25 = vld [vmem:[#allocation2 + $0x58] sm:$0xff] }
 0x1c0   : > { %v1233_v30 = vpop.eup %1232  ;;  %1244 = vtanh.f32 %v662_v3  ;;  %806 = vmatpush.msra.mxu2 %v1231_v27  ;;  %v711_v3 = vld [vmem:[#allocation2 + $0x60] sm:$0xff] }
 0x1c1   : > { %v1235_v6 = vpop.eup %1234  ;;  %1246 = vtanh.f32 %v603_v4  ;;  %862 = vmatpush.msra.mxu3 %v1233_v30 }
 0x1c2   : > { %v1237_v33 = vpop.eup %1236  ;;  %1248 = vtanh.f32 %v659_v26  ;;  %807 = vmatpush.msra.mxu2 %v1235_v6 }
 0x1c3   : > { %v1239_v5 = vpop.eup %1238  ;;  %1250 = vtanh.f32 %v600_v29  ;;  %863 = vmatpush.msra.mxu3 %v1237_v33 }
 0x1c4   : > { %v1241_v50 = vpop.eup %1240  ;;  %1252 = vtanh.f32 %v656_v31  ;;  %808 = vmatpush.msra.mxu2 %v1239_v5 }
 0x1c5   : > { %v1243_v48 = vpop.eup %1242  ;;  %1254 = vtanh.f32 %v597_v7  ;;  %864 = vmatpush.msra.mxu3 %v1241_v50 }
 0x1c6   : > { %v1245_v49 = vpop.eup %1244  ;;  %1256 = vtanh.f32 %v653_v34  ;;  %809 = vmatpush.msra.mxu2 %v1243_v48 }
 0x1c7   : > { %v1247_v12 = vpop.eup %1246  ;;  %1258 = vtanh.f32 %v594_v35  ;;  %865 = vmatpush.msra.mxu3 %v1245_v49 }
 0x1c8   : > { %v1249_v54 = vpop.eup %1248  ;;  %1260 = vtanh.f32 %v650_v51  ;;  %810 = vmatpush.msra.mxu2 %v1247_v12 }
 0x1c9   : > { %v1251_v44 = vpop.eup %1250  ;;  %1262 = vtanh.f32 %v591_v52  ;;  %866 = vmatpush.msra.mxu3 %v1249_v54 }
 0x1ca   : > { %v1253_v45 = vpop.eup %1252  ;;  %1264 = vtanh.f32 %v647_v46  ;;  %811 = vmatpush.msra.mxu2 %v1251_v44  ;;  %v762_v46 = vpop.permute.xlu2 %761 }
 0x1cb   : > { %v1255_v57 = vpop.eup %1254  ;;  %1266 = vtanh.f32 %v588_v47  ;;  %867 = vmatpush.msra.mxu3 %v1253_v45  ;;  %v754_v47 = vpop.permute.xlu1 %753 }
 0x1cc   : > { %v1257_v43 = vpop.eup %1256  ;;  %1268 = vtanh.f32 %v644_v9  ;;  %812 = vmatpush.msra.mxu2 %v1255_v57  ;;  %v758_v9 = vpop.permute.xlu0 %757 }
 0x1cd   : > { %v1259_v40 = vpop.eup %1258  ;;  %1270 = vtanh.f32 %v585_v8  ;;  %868 = vmatpush.msra.mxu3 %v1257_v43 }
 0x1ce   : > { %v1261_v60 = vpop.eup %1260  ;;  %1272 = vtanh.f32 %v641_v56  ;;  %813 = vmatpush.msra.mxu2 %v1259_v40 }
 0x1cf   : > { %v1263_v61 = vpop.eup %1262  ;;  %1274 = vtanh.f32 %v582_v58  ;;  %869 = vmatpush.msra.mxu3 %v1261_v60 }
 0x1d0   : > { %v1265_v39 = vpop.eup %1264  ;;  %1276 = vtanh.f32 %v638_v59  ;;  %814 = vmatpush.msra.mxu2 %v1263_v61  ;;  %v1383_v61 = vmov 4  }
 0x1d1   : > { %v1267_v62 = vpop.eup %1266  ;;  %1278 = vtanh.f32 %v579_v41  ;;  %870 = vmatpush.msra.mxu3 %v1265_v39  ;;  %1176 = vset.pattern.permute.xlu1 %v1383_v61 }
 0x1d2   : > { %v1269_v13 = vpop.eup %1268  ;;  %1280 = vtanh.f32 %v635_v38  ;;  %815 = vmatpush.msra.mxu2 %v1267_v62  ;;  %v750_v54 = vpop.permute.xlu2 %749  ;;  %1177 = vset.pattern.permute.xlu0 %v1383_v61 }
 0x1d3   : > { %v1271_v36 = vpop.eup %1270  ;;  %871 = vmatpush.msra.mxu3 %v1269_v13  ;;  %v746_v8 = vpop.permute.xlu1 %745  ;;  %986 = vperm.xlu1 %1176, %v1512_v14  }
 0x1d4   : > { %v1273_v11 = vpop.eup %1272  ;;  %816 = vmatpush.msra.mxu2 %v1271_v36  ;;  %v738_v57 = vpop.permute.xlu0 %737 }
 0x1d5   : > { %v1275_v63 = vpop.eup %1274  ;;  %872 = vmatpush.msra.mxu3 %v1273_v11 }
 0x1d6   : > { %v1277_v37 = vpop.eup %1276  ;;  %817 = vmatpush.msra.mxu2 %v1275_v63 }
 0x1d7   : > { %v1279_v1 = vpop.eup %1278  ;;  %873 = vmatpush.msra.mxu3 %v1277_v37 }
 0x1d8   : > { %v1281_v15 = vpop.eup %1280  ;;  %818 = vmatpush.msra.mxu2 %v1279_v1 }
 0x1d9   : > { %874 = vmatpush.msra.mxu3 %v1281_v15  ;;  %1099 = vmatmul.msk.f32.vlgmr.msra.gmra.mxu2 %vm521_vm0, %v699_v0 }
 0x1da   : > { %1112 = vmatmul.msk.f32.vlgmr.msra.gmra.mxu3 %vm521_vm0, %v699_v0  ;;  %v742_v45 = vpop.permute.xlu2 %741 }
 0x1db   : > { %v734_v62 = vpop.permute.xlu1 %733 }
 0x1e1   : > { %1100 = vmatmul.msk.f32.gmra.mxu2 %vm521_vm0, %v700_v16 }
 0x1e2   : > { %1113 = vmatmul.msk.f32.gmra.mxu3 %vm521_vm0, %v700_v16  ;;  %v730_v63 = vpop.permute.xlu2 %729  ;;  %v726_v16 = vpop.permute.xlu0 %725 }
 0x1e9   : > { %1101 = vmatmul.msk.f32.gmra.mxu2 %vm521_vm0, %v701_v17 }
 0x1ea   : > { %1114 = vmatmul.msk.f32.gmra.mxu3 %vm521_vm0, %v701_v17 }
 0x1f1   : > { %1102 = vmatmul.msk.f32.gmra.mxu2 %vm521_vm0, %v702_v10 }
 0x1f2   : > { %1115 = vmatmul.msk.f32.gmra.mxu3 %vm521_vm0, %v702_v10 }
 0x1f9   : > { %1103 = vmatmul.msk.f32.gmra.mxu2 %vm521_vm0, %v703_v20 }
 0x1fa   : > { %1116 = vmatmul.msk.f32.gmra.mxu3 %vm521_vm0, %v703_v20 }
 0x201   : > { %1104 = vmatmul.msk.f32.gmra.mxu2 %vm521_vm0, %v704_v21 }
 0x202   : > { %1117 = vmatmul.msk.f32.gmra.mxu3 %vm521_vm0, %v704_v21 }
 0x209   : > { %1105 = vmatmul.msk.f32.gmra.mxu2 %vm521_vm0, %v705_v18 }
 0x20a   : > { %1118 = vmatmul.msk.f32.gmra.mxu3 %vm521_vm0, %v705_v18 }
 0x211   : > { %1106 = vmatmul.msk.f32.gmra.mxu2 %vm521_vm0, %v706_v19 }
 0x212   : > { %1119 = vmatmul.msk.f32.gmra.mxu3 %vm521_vm0, %v706_v19 }
 0x219   : > { %1107 = vmatmul.msk.f32.gmra.mxu2 %vm521_vm0, %v707_v22 }
 0x21a   : > { %1120 = vmatmul.msk.f32.gmra.mxu3 %vm521_vm0, %v707_v22 }
 0x221   : > { %1108 = vmatmul.msk.f32.gmra.mxu2 %vm521_vm0, %v708_v23 }
 0x222   : > { %1121 = vmatmul.msk.f32.gmra.mxu3 %vm521_vm0, %v708_v23 }
 0x229   : > { %1109 = vmatmul.msk.f32.gmra.mxu2 %vm521_vm0, %v709_v24 }
 0x22a   : > { %1122 = vmatmul.msk.f32.gmra.mxu3 %vm521_vm0, %v709_v24 }
 0x231   : > { %1110 = vmatmul.msk.f32.gmra.mxu2 %vm521_vm0, %v710_v25 }
 0x232   : > { %1123 = vmatmul.msk.f32.gmra.mxu3 %vm521_vm0, %v710_v25 }
 0x239   : > { %1111 = vmatmul.msk.f32.gmra.mxu2 %vm521_vm0, %v711_v3 }
 0x23a   : > { %1124 = vmatmul.msk.f32.gmra.mxu3 %vm521_vm0, %v711_v3 }
 0x25c   : > { %v1709_v2 = vpop.f32.mrf.mxu2 }
 0x25d   : > { %v1711_v4 = vpop.f32.mrf.mxu3 }
 0x264   : > { %v1713_v26 = vpop.f32.mrf.mxu2 }
 0x265   : > { %v1715_v27 = vpop.f32.mrf.mxu3 }
 0x26c   : > { %v1717_v28 = vpop.f32.mrf.mxu2 }
 0x26d   : > { %v1719_v29 = vpop.f32.mrf.mxu3 }
 0x274   : > { %v1721_v30 = vpop.f32.mrf.mxu2 }
 0x275   : > { %v1723_v31 = vpop.f32.mrf.mxu3 }
 0x27c   : > { %v1725_v6 = vpop.f32.mrf.mxu2 }
 0x27d   : > { %v1727_v32 = vpop.f32.mrf.mxu3  ;;  %v833_v23 = vadd.f32 %v1725_v6, %v730_v63  ;;  %v718_v6 = vpop.permute.xlu2 %717 }
 0x27e   : > { %v889_v25 = vadd.f32 %v1727_v32, %v730_v63 }
 0x284   : > { %v835_v7 = vpop.f32.mrf.mxu2 }
 0x285   : > { %v1729_v33 = vpop.f32.mrf.mxu3  ;;  %v836_v21 = vadd.f32 %v835_v7, %v734_v62  ;;  %v830_v7 = vadd.f32 %v1721_v30, %v726_v16  ;;  %v714_v30 = vpop.permute.xlu0 %713 }
 0x286   : > { %v892_v19 = vadd.f32 %v1729_v33, %v734_v62  ;;  %v886_v33 = vadd.f32 %v1723_v31, %v726_v16 }
 0x28c   : > { %v838_v34 = vpop.f32.mrf.mxu2 }
 0x28d   : > { %v894_v5 = vpop.f32.mrf.mxu3  ;;  %v839_v17 = vadd.f32 %v838_v34, %v738_v57  ;;  %v722_v34 = vpop.permute.xlu1 %721 }
 0x28e   : > { %v895_v14 = vadd.f32 %v894_v5, %v738_v57 }
 0x294   : > { %v841_v35 = vpop.f32.mrf.mxu2 }
 0x295   : > { %v897_v50 = vpop.f32.mrf.mxu3  ;;  %v842_v37 = vadd.f32 %v841_v35, %v742_v45 }
 0x296   : > { %v898_v1 = vadd.f32 %v897_v50, %v742_v45  ;;  %v827_v50 = vadd.f32 %v1717_v28, %v722_v34  ;;  %v821_v28 = vadd.f32 %v1709_v2, %v714_v30  ;;  %v987_v45 = vpop.permute.xlu1 %986 }
 0x29c   : > { %v844_v51 = vpop.f32.mrf.mxu2 }
 0x29d   : > { %v900_v48 = vpop.f32.mrf.mxu3  ;;  %v845_v13 = vadd.f32 %v844_v51, %v746_v8  ;;  %v883_v51 = vadd.f32 %v1719_v29, %v722_v34  ;;  %v877_v29 = vadd.f32 %v1711_v4, %v714_v30 }
 0x29e   : > { %v901_v36 = vadd.f32 %v900_v48, %v746_v8 }
 0x2a4   : > { %v847_v52 = vpop.f32.mrf.mxu2 }
 0x2a5   : > { %v903_v49 = vpop.f32.mrf.mxu3  ;;  %v848_v38 = vadd.f32 %v847_v52, %v750_v54  ;;  %v824_v52 = vadd.f32 %v1713_v26, %v718_v6 }
 0x2a6   : > { %v904_v39 = vadd.f32 %v903_v49, %v750_v54  ;;  %v880_v49 = vadd.f32 %v1715_v27, %v718_v6 }
 0x2ac   : > { %v850_v12 = vpop.f32.mrf.mxu2 }
 0x2ad   : > { %v906_v53 = vpop.f32.mrf.mxu3  ;;  %v851_v41 = vadd.f32 %v850_v12, %v754_v47 }
 0x2ae   : > { %v907_v60 = vadd.f32 %v906_v53, %v754_v47 }
 0x2b4   : > { %v853_v44 = vpop.f32.mrf.mxu2 }
 0x2b5   : > { %v909_v55 = vpop.f32.mrf.mxu3  ;;  %v854_v42 = vadd.f32 %v853_v44, %v758_v9  ;;  %v941_v44 = vld [vmem:[%s1759_s4] sm:$0xff] }
 0x2b6   : > { %v910_v59 = vadd.f32 %v909_v55, %v758_v9 }
 0x2bc   : > { %v856_v56 = vpop.f32.mrf.mxu2 }
 0x2bd   : > { %v857_v58 = vadd.f32 %v856_v56, %v762_v46  ;;  %v912_v43 = vpop.f32.mrf.mxu3 }
 0x2be   : > { %v913_v40 = vadd.f32 %v912_v43, %v762_v46 }
 0x2bf   : > { %1282 = vtanh.f32 %v857_v58 }
 0x2c0   : > { %1284 = vtanh.f32 %v913_v40 }
 0x2c1   : > { %1286 = vtanh.f32 %v854_v42 }
 0x2c2   : > { %1288 = vtanh.f32 %v910_v59 }
 0x2c3   : > { %1290 = vtanh.f32 %v851_v41 }
 0x2c4   : > { %1292 = vtanh.f32 %v907_v60 }
 0x2c5   : > { %v1283_v11 = vpop.eup %1282  ;;  %1294 = vtanh.f32 %v848_v38 }
 0x2c6   : > { %v1285_v0 = vpop.eup %1284  ;;  %1296 = vtanh.f32 %v904_v39  ;;  %948 = vmatpush.msrb.mxu0 %v1283_v11 }
 0x2c7   : > { %v1287_v15 = vpop.eup %1286  ;;  %1298 = vtanh.f32 %v845_v13  ;;  %968 = vmatpush.msrb.mxu1 %v1285_v0 }
 0x2c8   : > { %v1289_v10 = vpop.eup %1288  ;;  %1300 = vtanh.f32 %v901_v36  ;;  %949 = vmatpush.msrb.mxu0 %v1287_v15 }
 0x2c9   : > { %v1291_v20 = vpop.eup %1290  ;;  %1302 = vtanh.f32 %v842_v37  ;;  %969 = vmatpush.msrb.mxu1 %v1289_v10 }
 0x2ca   : > { %v1293_v18 = vpop.eup %1292  ;;  %1304 = vtanh.f32 %v898_v1  ;;  %950 = vmatpush.msrb.mxu0 %v1291_v20 }
 0x2cb   : > { %v1295_v22 = vpop.eup %1294  ;;  %1306 = vtanh.f32 %v839_v17  ;;  %970 = vmatpush.msrb.mxu1 %v1293_v18 }
 0x2cc   : > { %v1297_v24 = vpop.eup %1296  ;;  %1308 = vtanh.f32 %v895_v14  ;;  %951 = vmatpush.msrb.mxu0 %v1295_v22 }
 0x2cd   : > { %v1299_v3 = vpop.eup %1298  ;;  %1310 = vtanh.f32 %v836_v21  ;;  %971 = vmatpush.msrb.mxu1 %v1297_v24 }
 0x2ce   : > { %v1301_v5 = vpop.eup %1300  ;;  %1312 = vtanh.f32 %v892_v19  ;;  %952 = vmatpush.msrb.mxu0 %v1299_v3 }
 0x2cf   : > { %v1303_v35 = vpop.eup %1302  ;;  %1314 = vtanh.f32 %v833_v23  ;;  %972 = vmatpush.msrb.mxu1 %v1301_v5 }
 0x2d0   : > { %v1305_v32 = vpop.eup %1304  ;;  %1316 = vtanh.f32 %v889_v25  ;;  %953 = vmatpush.msrb.mxu0 %v1303_v35 }
 0x2d1   : > { %v1307_v48 = vpop.eup %1306  ;;  %1318 = vtanh.f32 %v830_v7  ;;  %973 = vmatpush.msrb.mxu1 %v1305_v32 }
 0x2d2   : > { %v1309_v31 = vpop.eup %1308  ;;  %1320 = vtanh.f32 %v886_v33  ;;  %954 = vmatpush.msrb.mxu0 %v1307_v48 }
 0x2d3   : > { %v1311_v46 = vpop.eup %1310  ;;  %1322 = vtanh.f32 %v827_v50  ;;  %974 = vmatpush.msrb.mxu1 %v1309_v31 }
 0x2d4   : > { %v1313_v12 = vpop.eup %1312  ;;  %1324 = vtanh.f32 %v883_v51  ;;  %955 = vmatpush.msrb.mxu0 %v1311_v46 }
 0x2d5   : > { %v1315_v53 = vpop.eup %1314  ;;  %1326 = vtanh.f32 %v824_v52  ;;  %975 = vmatpush.msrb.mxu1 %v1313_v12 }
 0x2d6   : > { %v1317_v26 = vpop.eup %1316  ;;  %1328 = vtanh.f32 %v880_v49  ;;  %956 = vmatpush.msrb.mxu0 %v1315_v53 }
 0x2d7   : > { %v1319_v47 = vpop.eup %1318  ;;  %1330 = vtanh.f32 %v821_v28  ;;  %976 = vmatpush.msrb.mxu1 %v1317_v26 }
 0x2d8   : > { %v1321_v27 = vpop.eup %1320  ;;  %1332 = vtanh.f32 %v877_v29  ;;  %957 = vmatpush.msrb.mxu0 %v1319_v47 }
 0x2d9   : > { %v1323_v2 = vpop.eup %1322  ;;  %977 = vmatpush.msrb.mxu1 %v1321_v27 }
 0x2da   : > { %v1325_v54 = vpop.eup %1324  ;;  %958 = vmatpush.msrb.mxu0 %v1323_v2 }
 0x2db   : > { %v1327_v4 = vpop.eup %1326  ;;  %978 = vmatpush.msrb.mxu1 %v1325_v54 }
 0x2dc   : > { %v1329_v9 = vpop.eup %1328  ;;  %959 = vmatpush.msrb.mxu0 %v1327_v4 }
 0x2dd   : > { %v1331_v55 = vpop.eup %1330  ;;  %979 = vmatpush.msrb.mxu1 %v1329_v9 }
 0x2de   : > { %v1333_v8 = vpop.eup %1332  ;;  %960 = vmatpush.msrb.mxu0 %v1331_v55 }
 0x2df   : > { %980 = vmatpush.msrb.mxu1 %v1333_v8  ;;  %1125 = vmatmul.msk.f32.vlgmr.msrb.gmra.mxu0 %vm521_vm0, %v941_v44 }
 0x2e0   : > { %1126 = vmatmul.msk.f32.vlgmr.msrb.gmra.mxu1 %vm521_vm0, %v941_v44 }
 0x35c   : > { %v962_v57 = vpop.f32.mrf.mxu0 }
 0x35d   : > { %v982_v56 = vpop.f32.mrf.mxu1  ;;  %v989_v43 = vadd.f32 %v987_v45, %v962_v57 }
 0x35e   : > { %v990_v42 = vadd.f32 %v987_v45, %v982_v56 }
 0x360   : > { %v993_v58 = vrot.slane %v990_v42, 6 }
 0x362   : > { %v995_v59 = vsel %vm994_vm1, %v989_v43, %v993_v58 }
 0x363   : > { %997 = vst [vmem:[%s240_s16] sm:$0xf] %v995_v59 }
 0x364 PF: > { %s16_s18 = sadd.s32 1, %s1374_s18  }
 0x365   : > { %p13_p7 = scmp.ge.s32.totalorder %s16_s18, 4  }
 0x367   :  { %15 = sbr.rel (!%p13_p7) target bundleno = 1 (0x1), region = 75 }
 0x36c   :  { %1020 = vsyncpa [#allocation3], 1 }
 0x36d   :  { %1022 = vsyncpa [#allocation3 + $0x1], 1 }

</bundles_post_ra>
